<compile_context>
chip_gen: v7x
topology: tpu7x:2x2x1
jax: 0.10.0
libtpu: 0.0.40
codegen_flags: <defaults>
</compile_context>

<pallas_src>
import functools

import jax
import jax.numpy as jnp
from jax import lax
from jax.experimental import pallas as pl
from jax.experimental.pallas import tpu as pltpu

DENSE_DIM = 13
SITE_DIM = 24
APP_DIM = 32
EMB_DIM = 6
FEAT_DIM = DENSE_DIM + 2     # 15 input columns
OH_DIM = 128                 # lane-padded combined one-hot width (24 + 32 -> 128)


def _round_up(x, m):
    return ((x + m - 1) // m) * m


def wide_deep_kernel(x_ref, w_x_ref, w_oh_ref, out_ref):
    x = x_ref[...]                                                      # [TB, 15] f32
    tb = x.shape[0]

    # `.long()` in the PyTorch module truncates toward zero; int cast matches.
    site_l = x[:, DENSE_DIM:DENSE_DIM + 1].astype(jnp.int32)            # [TB, 1] in [0, 24)
    app_l = x[:, DENSE_DIM + 1:FEAT_DIM].astype(jnp.int32) + SITE_DIM   # [TB, 1] in [24, 56)

    # One combined one-hot from a single lane iota: site hits lanes 0..23, app
    # hits lanes 24..55; lanes 56..127 stay zero (w_oh is zero there too).
    lane = lax.broadcasted_iota(jnp.int32, (tb, OH_DIM), 1)
    onehot = ((lane == site_l) | (lane == app_l)).astype(jnp.float32)   # [TB, 128]

    # a @ b.T style contractions: results are [1, TB] (batch on lanes), so the
    # final store is lane-dense with no transpose needed.
    contract_last = (((1,), (1,)), ((), ()))
    logit = lax.dot_general(w_x_ref[...], x, contract_last,
                            preferred_element_type=jnp.float32)          # [1, TB]
    logit = logit + lax.dot_general(w_oh_ref[...], onehot, contract_last,
                                    preferred_element_type=jnp.float32)  # [1, TB]
    out_ref[...] = jax.nn.sigmoid(logit)[None]                           # [1, 1, TB]


@functools.partial(jax.jit, static_argnames=("block_b",))
def wide_and_deep(x, site_tab, app_tab, fusion_w, fusion_b, log_w, log_b,
                  *, block_b=16384):
    """x: [B, 15] f32; cols 0..12 dense, col 13 site idx (<24), col 14 app idx (<32)."""
    B = x.shape[0]

    # ---- Offline algebraic folding of the affine network ----------------------
    #   emb   = cat(site, app) @ fusion_w + fusion_b
    #   logit = cat(emb, dense) @ log_w + log_b
    #         = dense @ log_w[6:]
    #           + site_tab[si] @ (fusion_w[:6] @ log_w[:6]) + (fusion_b @ log_w[:6] + log_b)
    #           + app_tab[ai]  @ (fusion_w[6:] @ log_w[:6])
    w_emb = log_w[:EMB_DIM, 0]                                          # [6]
    w_dense = log_w[EMB_DIM:, 0]                                        # [13]
    bias = jnp.reshape(fusion_b, (-1,)) @ w_emb + jnp.reshape(log_b, (-1,))[0]
    site_vec = site_tab @ (fusion_w[:EMB_DIM] @ w_emb) + bias           # [24] (bias folded)
    app_vec = app_tab @ (fusion_w[EMB_DIM:] @ w_emb)                    # [32]

    # Fused weight rows: w_x multiplies the raw x tile (zeros under the two index
    # columns), w_oh multiplies the combined one-hot (lane-padded to 128).
    w_x = jnp.concatenate([w_dense, jnp.zeros((2,), jnp.float32)])[None, :]           # [1, 15]
    w_oh = jnp.concatenate(
        [site_vec, app_vec, jnp.zeros((OH_DIM - SITE_DIM - APP_DIM,), jnp.float32)]
    )[None, :]                                                                         # [1, 128]

    # ---- Batch tiling ----------------------------------------------------------
    # TB is a lane multiple (unmasked full-lane output stores, MXU-aligned N) and
    # large by default to amortize the ~0.35 us per-grid-step overhead.
    # Per-generation sweet spots: ~8K (v5e), ~16K (v6e), ~12-24K (v7x, 64 MiB/TC).
    if B < 128:
        tb = _round_up(B, 8)                     # tiny batch: exact single block
    else:
        tb = min(_round_up(block_b, 128), _round_up(B, 128))
    num_tiles = pl.cdiv(B, tb)

    # ~1.5 KiB of VMEM per row (double-buffered x tile + one-hot operand); request
    # that plus headroom, capped at v7x's 64 MiB physical VMEM per TensorCore.
    vmem_limit = int(min(64 * 1024 * 1024,
                         max(32 * 1024 * 1024, 3 * tb * 512 + (4 << 20))))

    out = pl.pallas_call(
        wide_deep_kernel,
        out_shape=jax.ShapeDtypeStruct((num_tiles, 1, tb), jnp.float32),
        grid=(num_tiles,),
        in_specs=[
            pl.BlockSpec((tb, FEAT_DIM), lambda i: (i, 0)),             # streamed x tile
            pl.BlockSpec((1, FEAT_DIM), lambda i: (0, 0)),              # VMEM-resident params
            pl.BlockSpec((1, OH_DIM), lambda i: (0, 0)),
        ],
        out_specs=pl.BlockSpec((1, 1, tb), lambda i: (i, 0, 0)),        # lane-dense rows
        compiler_params=pltpu.CompilerParams(
            dimension_semantics=("parallel",),                          # shard tiles across TCs
            vmem_limit_bytes=vmem_limit,
        ),
    )(x, w_x, w_oh)

    # Rows past B in the partial last tile read unspecified data; slice them off.
    return out.reshape(num_tiles * tb, 1)[:B]


def reference(x, site_tab, app_tab, fusion_w, fusion_b, log_w, log_b):
    dense = x[:, :DENSE_DIM]
    site_idx = x[:, DENSE_DIM].astype(jnp.int32)
    app_idx = x[:, DENSE_DIM + 1].astype(jnp.int32)
    emb = jnp.concatenate([site_tab[site_idx], app_tab[app_idx]], axis=1) @ fusion_w + fusion_b
    logit = jnp.concatenate([emb, dense], axis=1) @ log_w + log_b
    return jax.nn.sigmoid(logit)


if __name__ == "__main__":
    key = jax.random.PRNGKey(0)
    (k_dense, k_site, k_app, k_st, k_at, k_fw, k_fb, k_lw, k_lb) = jax.random.split(key, 9)

    # Parameters (PyTorch Linear weights are [out, in]; stored pre-transposed [in, out]).
    site_tab = jax.random.normal(k_st, (SITE_DIM, EMB_DIM), dtype=jnp.float32)
    app_tab = jax.random.normal(k_at, (APP_DIM, EMB_DIM), dtype=jnp.float32)
    fusion_w = jax.random.normal(k_fw, (2 * EMB_DIM, EMB_DIM), dtype=jnp.float32) * 0.3
    fusion_b = jax.random.normal(k_fb, (EMB_DIM,), dtype=jnp.float32) * 0.1
    log_w = jax.random.normal(k_lw, (EMB_DIM + DENSE_DIM, 1), dtype=jnp.float32) * 0.3
    log_b = jax.random.normal(k_lb, (1,), dtype=jnp.float32) * 0.1

    def make_x(kd, ks, ka, batch):
        dense = jax.random.normal(kd, (batch, DENSE_DIM), dtype=jnp.float32)
        s = jax.random.randint(ks, (batch,), 0, SITE_DIM).astype(jnp.float32)
        a = jax.random.randint(ka, (batch,), 0, APP_DIM).astype(jnp.float32)
        return jnp.concatenate([dense, s[:, None], a[:, None]], axis=1)   # [batch, 15]

    # Small batch (single exact tile).
    x_small = make_x(k_dense, k_site, k_app, 8)
    out_small = jax.block_until_ready(
        wide_and_deep(x_small, site_tab, app_tab, fusion_w, fusion_b, log_w, log_b))
    ref_small = reference(x_small, site_tab, app_tab, fusion_w, fusion_b, log_w, log_b)
    assert out_small.shape == (8, 1)
    assert jnp.allclose(out_small, ref_small, atol=1e-5, rtol=1e-5), "mismatch (small batch)"

    # Multi-tile batch with a partial last tile (exercises the cdiv grid path;
    # rows past B in the last tile are unspecified and sliced off).
    kd2, ks2, ka2 = jax.random.split(k_dense, 3)
    x_big = make_x(kd2, ks2, ka2, 200)
    out_big = jax.block_until_ready(
        wide_and_deep(x_big, site_tab, app_tab, fusion_w, fusion_b, log_w, log_b,
                      block_b=128))
    ref_big = reference(x_big, site_tab, app_tab, fusion_w, fusion_b, log_w, log_b)
    assert out_big.shape == (200, 1)
    assert jnp.allclose(out_big, ref_big, atol=1e-5, rtol=1e-5), "mismatch (multi-tile batch)"

    print("KERNEL_OK")
</pallas_src>

<mosaic_0001>
module attributes {stable_mosaic.version = 11 : i64} {
  func.func @wide_deep_kernel(%arg0: i32, %arg1: memref<8x15xf32, #tpu.memory_space<vmem>>, %arg2: memref<1x15xf32, #tpu.memory_space<vmem>>, %arg3: memref<1x128xf32, #tpu.memory_space<vmem>>, %arg4: memref<1x1x8xf32, #tpu.memory_space<vmem>>) attributes {dimension_semantics = [#tpu.dimension_semantics<parallel>], iteration_bounds = array<i64: 1>, scalar_prefetch = 0 : i64, scratch_operands = 0 : i64, tpu.core_type = #tpu.core_type<tc>, window_params = [{transform_indices = @transform_0, window_bounds = array<i64: 8, 15>}, {pipeline_mode = #tpu.pipeline_mode<synchronous>, transform_indices = @transform_1, window_bounds = array<i64: 1, 15>}, {pipeline_mode = #tpu.pipeline_mode<synchronous>, transform_indices = @transform_2, window_bounds = array<i64: 1, 128>}, {transform_indices = @transform_3, window_bounds = array<i64: 1, 1, 8>}]} {
    %c0 = arith.constant 0 : index
    %c0_0 = arith.constant 0 : index
    %0 = vector.load %arg1[%c0, %c0_0] : memref<8x15xf32, #tpu.memory_space<vmem>>, vector<8x15xf32>
    %1 = vector.extract_strided_slice %0 {offsets = [0, 13], sizes = [8, 1], strides = [1, 1]} : vector<8x15xf32> to vector<8x1xf32>
    %2 = arith.fptosi %1 : vector<8x1xf32> to vector<8x1xi32>
    %3 = vector.extract_strided_slice %0 {offsets = [0, 14], sizes = [8, 1], strides = [1, 1]} : vector<8x15xf32> to vector<8x1xf32>
    %4 = arith.fptosi %3 : vector<8x1xf32> to vector<8x1xi32>
    %c24_i32 = arith.constant 24 : i32
    %5 = vector.broadcast %c24_i32 : i32 to vector<8x1xi32>
    %6 = arith.addi %4, %5 : vector<8x1xi32>
    %7 = tpu.iota {dimensions = array<i32: 1>} : vector<8x128xi32>
    %8 = vector.broadcast %2 : vector<8x1xi32> to vector<8x128xi32>
    %9 = arith.cmpi eq, %7, %8 : vector<8x128xi32>
    %10 = vector.broadcast %6 : vector<8x1xi32> to vector<8x128xi32>
    %11 = arith.cmpi eq, %7, %10 : vector<8x128xi32>
    %12 = arith.ori %9, %11 : vector<8x128xi1>
    %13 = arith.extui %12 : vector<8x128xi1> to vector<8x128xi32>
    %14 = arith.sitofp %13 : vector<8x128xi32> to vector<8x128xf32>
    %c0_1 = arith.constant 0 : index
    %c0_2 = arith.constant 0 : index
    %15 = vector.load %arg2[%c0_1, %c0_2] : memref<1x15xf32, #tpu.memory_space<vmem>>, vector<1x15xf32>
    %cst = arith.constant dense<0.000000e+00> : vector<1x8xf32>
    %16 = tpu.matmul %15, %0, %cst {dimension_numbers = #tpu.dot_dimension_numbers<[1], [1], [0], [0], [0, 0, 1, 0], [], []>} : vector<1x15xf32>, vector<8x15xf32>, vector<1x8xf32> -> vector<1x8xf32>
    %c0_3 = arith.constant 0 : index
    %c0_4 = arith.constant 0 : index
    %17 = vector.load %arg3[%c0_3, %c0_4] : memref<1x128xf32, #tpu.memory_space<vmem>>, vector<1x128xf32>
    %cst_5 = arith.constant dense<0.000000e+00> : vector<1x8xf32>
    %18 = tpu.matmul %17, %14, %cst_5 {dimension_numbers = #tpu.dot_dimension_numbers<[1], [1], [0], [0], [0, 0, 1, 0], [], []>} : vector<1x128xf32>, vector<8x128xf32>, vector<1x8xf32> -> vector<1x8xf32>
    %19 = arith.addf %16, %18 : vector<1x8xf32>
    %20 = arith.negf %19 : vector<1x8xf32>
    %21 = math.exp %20 : vector<1x8xf32>
    %cst_6 = arith.constant 1.000000e+00 : f32
    %22 = vector.broadcast %cst_6 : f32 to vector<1x8xf32>
    %23 = arith.addf %22, %21 : vector<1x8xf32>
    %24 = arith.divf %22, %23 : vector<1x8xf32>
    %25 = vector.shape_cast %24 : vector<1x8xf32> to vector<1x1x8xf32>
    %c0_7 = arith.constant 0 : index
    %c0_8 = arith.constant 0 : index
    %c0_9 = arith.constant 0 : index
    %26 = vector.load %arg4[%c0_7, %c0_8, %c0_9] : memref<1x1x8xf32, #tpu.memory_space<vmem>>, vector<1x1x8xf32>
    tpu.vector_store %arg4[%c0_7, %c0_8, %c0_9], %25 {strides = array<i32>} : memref<1x1x8xf32, #tpu.memory_space<vmem>>, vector<1x1x8xf32>,
    return
  }
  func.func @transform_0(%arg0: i32) -> (i32, i32) {
    %c0_i32 = arith.constant 0 : i32
    %c0_i32_0 = arith.constant 0 : i32
    return %arg0, %c0_i32 : i32, i32
  }
  func.func @transform_1(%arg0: i32) -> (i32, i32) {
    %c0_i32 = arith.constant 0 : i32
    %c0_i32_0 = arith.constant 0 : i32
    %c0_i32_1 = arith.constant 0 : i32
    return %c0_i32, %c0_i32_0 : i32, i32
  }
  func.func @transform_2(%arg0: i32) -> (i32, i32) {
    %c0_i32 = arith.constant 0 : i32
    %c0_i32_0 = arith.constant 0 : i32
    %c0_i32_1 = arith.constant 0 : i32
    return %c0_i32, %c0_i32_0 : i32, i32
  }
  func.func @transform_3(%arg0: i32) -> (i32, i32, i32) {
    %c0_i32 = arith.constant 0 : i32
    %c0_i32_0 = arith.constant 0 : i32
    %c0_i32_1 = arith.constant 0 : i32
    return %arg0, %c0_i32, %c0_i32_0 : i32, i32, i32
  }
}

</mosaic_0001>

<bundles_post_ra>
// kernel: wide_and_deep.1
= control target key start
LH: loop header
LB: loop body
LE: loop exit
PB: predicated region body
PF: predicated region fallthrough
CT: control target
= control target key end

     0   :  { %s307_s0 = inlined_call_operand.vmem [shape: f32[8,15], index: 0, kind: input, shape index: {}]   ;;  %s308_s1 = inlined_call_operand.vmem [shape: f32[1,15], index: 1, kind: input, shape index: {}]   ;;  %s309_s2 = inlined_call_operand.vmem [shape: f32[1,128], index: 2, kind: input, shape index: {}]   ;;  %s310_s3 = inlined_call_operand.hbm [shape: f32[1,1,8], index: 3, kind: output, shape index: {}]  }
   0x1   :  { %v15_v0 = vld [vmem:[%s307_s0] sm:$0xff] }
   0x2   :  { %8 = vsyncpa [#allocation3], 0  ;;  %v260_v1 = vmov 13   ;;  %v222_v2 = vtrunc.f32 %v15_v0  ;;  %v261_v5 = vmov 14   ;;  %v262_v6 = vmov 0.0  }
   0x3   :  { %230 = vset.pattern.permute.xlu0 %v260_v1  ;;  %216 = vmatprep.subr.mxu0 %v262_v6  ;;  %vm103_vm0 = vcmask 121856   ;;  %v31_v7 = vld [vmem:[%s308_s1] sm:$0x1]  ;;  %vm263_vm1 = vmmov 0   ;;  %v18_v8 = vlaneseq  ;;  %v264_v12 = vmov 1.0   ;;  %s265_s1 = smov [#allocation2]  }
   0x4   :  { %v223_v3 = vcvt.f32.s32 %v222_v2  ;;  %211 = vmatprep.subr.mxu1 %v262_v6  ;;  %217 = vmatpush3.xpose.msk.msra.mxu0 %vm103_vm0, %v15_v0  ;;  %v32_v13 = vld [vmem:[%s309_s2] sm:$0x1]  ;;  %s194_s17 = sshll.u32 %s265_s1, 4  ;;  %vm186_vm5 = vcmask 57344   ;;  %s195_s17 = int_to_ptr.vmem [resolvable:$true] %s194_s17 }
   0x5   :  { %218 = vmatprep.mubr.msk.f32.mxu0 %vm263_vm1, %v262_v6  ;;  %213 = vmatprep.mubr.msk.f32.mxu1 %vm263_vm1, %v262_v6  ;;  %v19_v10 = vand.u32 127, %v18_v8  ;;  %s236_s18 = scalar_lea.vmem %s195_s17, 16  ;;  %s240_s2 = scalar_lea.vmem %s195_s17, 32 }
   0x6   :  { %21 = vperm.xlu0 %230, %v223_v3   ;;  %v17_v4 = vadd.s32 24, %v223_v3  ;;  %p237_p0 = scmp.ne.s32.totalorder %s195_s17, %s236_s18  ;;  %p241_p1 = scmp.lt.s32.totalorder %s195_s17, %s195_s17 }
   0x7   :  { %219 = vmatmul.mubr.msk.f32.vlgmr.msra.gmra.mrb[0].mxu0 %vm103_vm0, %v31_v7  ;;  %p242_p2 = scmp.lt.s32.totalorder %s240_s2, %s236_s18 }
   0x9   :  { %p243_p3 = por %p242_p2, %p241_p1 }
   0xa   :  { %231 = vset.pattern.permute.xlu0 %v261_v5 }
   0xb   :  { %25 = vperm.xlu0 %231, %v17_v4   ;;  %p244_p4 = pnand %p243_p3, %p237_p0 }
  0x85   :  { %v22_v9 = vpop.permute.xlu0 %21 }
  0x86   :  { %vm23_vm2 = vcmp.eq.s32.totalorder %v19_v10, %v22_v9 }
  0x8a   :  { %v26_v11 = vpop.permute.xlu0 %25 }
  0x8b   :  { %vm27_vm3 = vcmp.eq.s32.totalorder %v19_v10, %v26_v11 }
  0x8c   :  { %vm28_vm4 = vmor %vm23_vm2, %vm27_vm3 }
  0x8d   :  { %212 = vmatpush3.xpose.msk.msra.mxu1 %vm28_vm4, %v264_v12 }
  0x90   :  { %214 = vmatmul.mubr.f32.vlgmr.msra.gmra.mrb[0].mxu1 %v32_v13 }
  0xda   :  { %v176_v14 = vpop.f32.mrb[0].mxu0 }
  0xdb   :  { %v220_v15 = vpop.f32.mrb[1].mxu0 }
 0x163   :  { %v99_v16 = vpop.f32.mrb[0].mxu1 }
 0x164   :  { %v177_v17 = vadd.f32 %v176_v14, %v99_v16  ;;  %v215_v18 = vpop.f32.mrb[1].mxu1 }
 0x166   :  { %v206_v19 = vmul.f32 -1.442695, %v177_v17 }
 0x168   :  { %232 = vpow2.f32 %v206_v19 }
 0x172   :  { %v233_v20 = vpop.eup %232 }
 0x173   :  { %v183_v21 = vadd.f32 1.0, %v233_v20 }
 0x175   :  { %234 = vrcp.f32 %v183_v21 }
 0x17f   :  { %v235_v22 = vpop.eup %234 }
 0x180   :  { %187 = vst.msk [vmem:[#allocation2] sm:$0x1] %vm186_vm5, %v235_v22 }
 0x181   :  { %247 = shalt.err (!%p244_p4)
}
 0x182   :  { %s248_s21 = scalar_lea.hbm %s310_s3, 16 }
 0x183   :  { %p249_p5 = scmp.ne.s32.totalorder %s310_s3, %s248_s21  ;;  %p252_p6 = scmp.lt.u32.totalorder %s248_s21, %s310_s3 }
 0x185   :  { %p254_p7 = pnand %p252_p6, %p249_p5 }
 0x187   :  { %257 = shalt.err (!%p254_p7)
}
 0x188   :  { %197 = dma.vmem_to_hbm [thread:$0]  %s195_s17, 16, %s310_s3, [#allocation3]  }
 0x189   :  { %258 = dma.done.wait [#allocation3], 16  }
 0x18a   :  { %259 = vsyncadd [#allocation3], 4294967280 }
 0x18b   :  { %201 = vsyncpa [#allocation3], 1 }

</bundles_post_ra>
